<compile_context>
chip_gen: v7x
topology: tpu7x:2x2x1
jax: 0.10.0
libtpu: 0.0.40
codegen_flags: <defaults>
</compile_context>

<pallas_src>
import functools

import jax
import jax.numpy as jnp
from jax.experimental import pallas as pl
from jax.experimental.pallas import tpu as pltpu


SUBLANE = 8
MAX_BATCH_TILE = 512           # rows per grid step (larger tiles ~85% of HBM roofline)
MIN_BATCH_FOR_TWO_STEPS = 16   # v7x: force >=2 grid steps so both TensorCores engage


def _round_up(x, m):
    return ((x + m - 1) // m) * m


def _make_mlp_kernel(n_layers):
    """Fused MLP kernel body: refs = (x, w0, b0, w1, b1, ..., out)."""

    def kernel(*refs):
        x_ref = refs[0]
        o_ref = refs[-1]
        h = x_ref[...]
        for i in range(n_layers):
            w = refs[1 + 2 * i][...]          # (in_f, out_f), f32 or bf16
            b = refs[2 + 2 * i][...]          # (1, out_f), always f32
            # MXU matmul with f32 accumulation; bias + ReLU on the VPU in f32.
            acc = jnp.dot(h.astype(w.dtype), w, preferred_element_type=jnp.float32)
            h = jnp.maximum(acc + b, 0.0)
            if w.dtype != jnp.float32 and i + 1 < n_layers:
                # bf16 inter-layer activation halves vreg/VMEM pressure at big tiles.
                h = h.astype(w.dtype)
        o_ref[...] = h.astype(o_ref.dtype)

    return kernel


def prepare_params(weights, biases, param_dtype=jnp.float32):
    """One-time glue: transpose PyTorch-convention Linear params. NO feature padding.

    Args:
      weights: list of (out_f, in_f) arrays (PyTorch nn.Linear convention)
      biases:  list of (out_f,) arrays
      param_dtype: storage dtype for weights (bf16 recommended on v6e/v7x);
                   biases always stay f32.
    Returns:
      Tuple (w0_t, b0, w1_t, b1, ...) with w_t: (in_f, out_f), b: (1, out_f) f32.
    """
    params = []
    for w, b in zip(weights, biases):
        w_t = jnp.asarray(w).T.astype(param_dtype)                 # (in_f, out_f)
        b_p = jnp.asarray(b).astype(jnp.float32).reshape(1, -1)    # (1, out_f) f32
        params.extend([w_t, b_p])
    return tuple(params)


@jax.jit
def simple_model_forward(x, params):
    """Forward pass equivalent to SimpleModel.forward (ReLU after every layer).

    Args:
      x:      (batch, num_inputs) array
      params: output of prepare_params (cached, NOT rebuilt per call)
    Returns:
      (batch, num_outputs) float32
    """
    n_layers = len(params) // 2
    batch, num_inputs = x.shape
    num_outputs = params[-2].shape[1]
    compute_dtype = params[0].dtype

    # ---- Batch tiling: minimize over-padding, >=2 steps for v7x megacore ----
    b_pad = _round_up(batch, SUBLANE)
    min_steps = 2 if batch >= MIN_BATCH_FOR_TWO_STEPS else 1
    n_steps = max(pl.cdiv(b_pad, MAX_BATCH_TILE), min_steps)
    tb = _round_up(pl.cdiv(b_pad, n_steps), SUBLANE)
    b_pad = tb * pl.cdiv(b_pad, tb)
    grid = (b_pad // tb,)

    # ---- Input: sublane-pad batch only; keep num_inputs unpadded in HBM ----
    x_c = x.astype(compute_dtype)
    if b_pad != batch:
        x_p = jnp.zeros((b_pad, num_inputs), compute_dtype).at[:batch].set(x_c)
    else:
        x_p = x_c

    kernel = _make_mlp_kernel(n_layers)

    # Full-array blocks for params (exempt from the (8,128) rule); batch-tiled x/out.
    x_spec = pl.BlockSpec((tb, num_inputs), lambda i: (i, 0))
    param_specs = [pl.BlockSpec(p.shape, lambda i: (0, 0)) for p in params]
    out_spec = pl.BlockSpec((tb, num_outputs), lambda i: (i, 0))

    # ---- Explicit VMEM budget (v5e default scoped limit is only 16 MiB) ----
    param_bytes = sum(p.size * jnp.dtype(p.dtype).itemsize for p in params)
    widest = max([num_inputs, num_outputs] + [p.shape[1] for p in params[0::2]])
    io_bytes = 2 * tb * (num_inputs * jnp.dtype(compute_dtype).itemsize + num_outputs * 4)
    act_bytes = 4 * tb * widest * 4
    vmem_limit = int(min(64 << 20,  # v7x physical VMEM per TensorCore
                         max(32 << 20, 2 * (2 * param_bytes + io_bytes + act_bytes))))

    out = pl.pallas_call(
        kernel,
        out_shape=jax.ShapeDtypeStruct((b_pad, num_outputs), jnp.float32),
        grid=grid,
        in_specs=[x_spec, *param_specs],
        out_specs=out_spec,
        compiler_params=pltpu.CompilerParams(
            dimension_semantics=("parallel",),
            vmem_limit_bytes=vmem_limit),
    )(x_p, *params)

    return out[:batch]


def _init_linear(key, out_f, in_f):
    # Deterministic init mimicking nn.Linear (uniform +/- 1/sqrt(in_f)).
    kw, kb = jax.random.split(key)
    bound = 1.0 / jnp.sqrt(jnp.float32(in_f))
    w = jax.random.uniform(kw, (out_f, in_f), jnp.float32, -bound, bound)
    b = jax.random.uniform(kb, (out_f,), jnp.float32, -bound, bound)
    return w, b


def _reference_forward(x, weights, biases):
    h = x
    for w, b in zip(weights, biases):
        h = jnp.maximum(h @ w.T + b, 0.0)
    return h


if __name__ == "__main__":
    # CartPole-like config: 4 observations -> [32, 32] hidden -> 2 actions.
    num_inputs = 4
    hidden_layer_sizes = [32, 32]
    num_outputs = 2
    batch = 8

    latent_sizes = [num_inputs, *hidden_layer_sizes, num_outputs]

    key = jax.random.PRNGKey(0)
    keys = jax.random.split(key, len(latent_sizes))  # 1 for input + 1 per layer

    x = jax.random.normal(keys[0], (batch, num_inputs), jnp.float32)

    weights, biases = [], []
    for i, (in_f, out_f) in enumerate(zip(latent_sizes[:-1], latent_sizes[1:])):
        w, b = _init_linear(keys[i + 1], out_f, in_f)
        weights.append(w)
        biases.append(b)

    # One-time parameter preparation (cached across calls).
    # Use param_dtype=jnp.bfloat16 on v6e/v7x for halved weight DMA (relax tolerance).
    params = prepare_params(weights, biases, param_dtype=jnp.float32)

    # First call compiles; second call reuses the cached executable + cached params.
    out = simple_model_forward(x, params)
    out = simple_model_forward(x, params)
    out = jax.block_until_ready(out)

    ref = _reference_forward(x, weights, biases)
    assert out.shape == (batch, num_outputs)
    assert jnp.allclose(out, ref, atol=1e-5, rtol=1e-5), "mismatch vs reference"

    print("KERNEL_OK")
</pallas_src>

<mosaic_0001>
module attributes {stable_mosaic.version = 11 : i64} {
  func.func @kernel(%arg0: i32, %arg1: memref<8x4xf32, #tpu.memory_space<vmem>>, %arg2: memref<4x32xf32, #tpu.memory_space<vmem>>, %arg3: memref<1x32xf32, #tpu.memory_space<vmem>>, %arg4: memref<32x32xf32, #tpu.memory_space<vmem>>, %arg5: memref<1x32xf32, #tpu.memory_space<vmem>>, %arg6: memref<32x2xf32, #tpu.memory_space<vmem>>, %arg7: memref<1x2xf32, #tpu.memory_space<vmem>>, %arg8: memref<8x2xf32, #tpu.memory_space<vmem>>) attributes {dimension_semantics = [#tpu.dimension_semantics<parallel>], iteration_bounds = array<i64: 1>, scalar_prefetch = 0 : i64, scratch_operands = 0 : i64, tpu.core_type = #tpu.core_type<tc>, window_params = [{transform_indices = @transform_0, window_bounds = array<i64: 8, 4>}, {pipeline_mode = #tpu.pipeline_mode<synchronous>, transform_indices = @transform_1, window_bounds = array<i64: 4, 32>}, {pipeline_mode = #tpu.pipeline_mode<synchronous>, transform_indices = @transform_2, window_bounds = array<i64: 1, 32>}, {pipeline_mode = #tpu.pipeline_mode<synchronous>, transform_indices = @transform_3, window_bounds = array<i64: 32, 32>}, {pipeline_mode = #tpu.pipeline_mode<synchronous>, transform_indices = @transform_4, window_bounds = array<i64: 1, 32>}, {pipeline_mode = #tpu.pipeline_mode<synchronous>, transform_indices = @transform_5, window_bounds = array<i64: 32, 2>}, {pipeline_mode = #tpu.pipeline_mode<synchronous>, transform_indices = @transform_6, window_bounds = array<i64: 1, 2>}, {transform_indices = @transform_7, window_bounds = array<i64: 8, 2>}]} {
    %c0 = arith.constant 0 : index
    %c0_0 = arith.constant 0 : index
    %0 = vector.load %arg1[%c0, %c0_0] : memref<8x4xf32, #tpu.memory_space<vmem>>, vector<8x4xf32>
    %c0_1 = arith.constant 0 : index
    %c0_2 = arith.constant 0 : index
    %1 = vector.load %arg2[%c0_1, %c0_2] : memref<4x32xf32, #tpu.memory_space<vmem>>, vector<4x32xf32>
    %c0_3 = arith.constant 0 : index
    %c0_4 = arith.constant 0 : index
    %2 = vector.load %arg3[%c0_3, %c0_4] : memref<1x32xf32, #tpu.memory_space<vmem>>, vector<1x32xf32>
    %cst = arith.constant dense<0.000000e+00> : vector<8x32xf32>
    %3 = tpu.matmul %0, %1, %cst {dimension_numbers = #tpu.dot_dimension_numbers<[1], [0], [0], [1], [0, 0, 1, 1], [], []>} : vector<8x4xf32>, vector<4x32xf32>, vector<8x32xf32> -> vector<8x32xf32>
    %4 = vector.broadcast %2 : vector<1x32xf32> to vector<8x32xf32>
    %5 = arith.addf %3, %4 : vector<8x32xf32>
    %cst_5 = arith.constant 0.000000e+00 : f32
    %6 = vector.broadcast %cst_5 : f32 to vector<8x32xf32>
    %7 = arith.maximumf %5, %6 : vector<8x32xf32>
    %c0_6 = arith.constant 0 : index
    %c0_7 = arith.constant 0 : index
    %8 = vector.load %arg4[%c0_6, %c0_7] : memref<32x32xf32, #tpu.memory_space<vmem>>, vector<32x32xf32>
    %c0_8 = arith.constant 0 : index
    %c0_9 = arith.constant 0 : index
    %9 = vector.load %arg5[%c0_8, %c0_9] : memref<1x32xf32, #tpu.memory_space<vmem>>, vector<1x32xf32>
    %cst_10 = arith.constant dense<0.000000e+00> : vector<8x32xf32>
    %10 = tpu.matmul %7, %8, %cst_10 {dimension_numbers = #tpu.dot_dimension_numbers<[1], [0], [0], [1], [0, 0, 1, 1], [], []>} : vector<8x32xf32>, vector<32x32xf32>, vector<8x32xf32> -> vector<8x32xf32>
    %11 = vector.broadcast %9 : vector<1x32xf32> to vector<8x32xf32>
    %12 = arith.addf %10, %11 : vector<8x32xf32>
    %cst_11 = arith.constant 0.000000e+00 : f32
    %13 = vector.broadcast %cst_11 : f32 to vector<8x32xf32>
    %14 = arith.maximumf %12, %13 : vector<8x32xf32>
    %c0_12 = arith.constant 0 : index
    %c0_13 = arith.constant 0 : index
    %15 = vector.load %arg6[%c0_12, %c0_13] : memref<32x2xf32, #tpu.memory_space<vmem>>, vector<32x2xf32>
    %c0_14 = arith.constant 0 : index
    %c0_15 = arith.constant 0 : index
    %16 = vector.load %arg7[%c0_14, %c0_15] : memref<1x2xf32, #tpu.memory_space<vmem>>, vector<1x2xf32>
    %cst_16 = arith.constant dense<0.000000e+00> : vector<8x2xf32>
    %17 = tpu.matmul %14, %15, %cst_16 {dimension_numbers = #tpu.dot_dimension_numbers<[1], [0], [0], [1], [0, 0, 1, 1], [], []>} : vector<8x32xf32>, vector<32x2xf32>, vector<8x2xf32> -> vector<8x2xf32>
    %18 = vector.broadcast %16 : vector<1x2xf32> to vector<8x2xf32>
    %19 = arith.addf %17, %18 : vector<8x2xf32>
    %cst_17 = arith.constant 0.000000e+00 : f32
    %20 = vector.broadcast %cst_17 : f32 to vector<8x2xf32>
    %21 = arith.maximumf %19, %20 : vector<8x2xf32>
    %c0_18 = arith.constant 0 : index
    %c0_19 = arith.constant 0 : index
    %22 = vector.load %arg8[%c0_18, %c0_19] : memref<8x2xf32, #tpu.memory_space<vmem>>, vector<8x2xf32>
    tpu.vector_store %arg8[%c0_18, %c0_19], %21 {strides = array<i32>} : memref<8x2xf32, #tpu.memory_space<vmem>>, vector<8x2xf32>,
    return
  }
  func.func @transform_0(%arg0: i32) -> (i32, i32) {
    %c0_i32 = arith.constant 0 : i32
    %c0_i32_0 = arith.constant 0 : i32
    return %arg0, %c0_i32 : i32, i32
  }
  func.func @transform_1(%arg0: i32) -> (i32, i32) {
    %c0_i32 = arith.constant 0 : i32
    %c0_i32_0 = arith.constant 0 : i32
    %c0_i32_1 = arith.constant 0 : i32
    return %c0_i32, %c0_i32_0 : i32, i32
  }
  func.func @transform_2(%arg0: i32) -> (i32, i32) {
    %c0_i32 = arith.constant 0 : i32
    %c0_i32_0 = arith.constant 0 : i32
    %c0_i32_1 = arith.constant 0 : i32
    return %c0_i32, %c0_i32_0 : i32, i32
  }
  func.func @transform_3(%arg0: i32) -> (i32, i32) {
    %c0_i32 = arith.constant 0 : i32
    %c0_i32_0 = arith.constant 0 : i32
    %c0_i32_1 = arith.constant 0 : i32
    return %c0_i32, %c0_i32_0 : i32, i32
  }
  func.func @transform_4(%arg0: i32) -> (i32, i32) {
    %c0_i32 = arith.constant 0 : i32
    %c0_i32_0 = arith.constant 0 : i32
    %c0_i32_1 = arith.constant 0 : i32
    return %c0_i32, %c0_i32_0 : i32, i32
  }
  func.func @transform_5(%arg0: i32) -> (i32, i32) {
    %c0_i32 = arith.constant 0 : i32
    %c0_i32_0 = arith.constant 0 : i32
    %c0_i32_1 = arith.constant 0 : i32
    return %c0_i32, %c0_i32_0 : i32, i32
  }
  func.func @transform_6(%arg0: i32) -> (i32, i32) {
    %c0_i32 = arith.constant 0 : i32
    %c0_i32_0 = arith.constant 0 : i32
    %c0_i32_1 = arith.constant 0 : i32
    return %c0_i32, %c0_i32_0 : i32, i32
  }
  func.func @transform_7(%arg0: i32) -> (i32, i32) {
    %c0_i32 = arith.constant 0 : i32
    %c0_i32_0 = arith.constant 0 : i32
    return %arg0, %c0_i32 : i32, i32
  }
}

</mosaic_0001>

<bundles_post_ra>
// kernel: simple_model_forward.1
= control target key start
LH: loop header
LB: loop body
LE: loop exit
PB: predicated region body
PF: predicated region fallthrough
CT: control target
= control target key end

     0   :  { %vm39_vm0 = vcmask 1043456   ;;  %vm35_vm1 = vcmask 31744   ;;  %v352_v0 = vmov 0.0   ;;  %vm353_vm2 = vmmov 0   ;;  %s437_s1 = inlined_call_operand.vmem [shape: f32[4,32], index: 1, kind: input, shape index: {}]   ;;  %s438_s0 = inlined_call_operand.vmem [shape: f32[8,4], index: 0, kind: input, shape index: {}]   ;;  %s439_s3 = inlined_call_operand.vmem [shape: f32[32,32], index: 3, kind: input, shape index: {}]   ;;  %s440_s5 = inlined_call_operand.vmem [shape: f32[32,2], index: 5, kind: input, shape index: {}]   ;;  %s441_s2 = inlined_call_operand.vmem [shape: f32[1,32], index: 2, kind: input, shape index: {}]   ;;  %s442_s4 = inlined_call_operand.vmem [shape: f32[1,32], index: 4, kind: input, shape index: {}]   ;;  %s443_s6 = inlined_call_operand.vmem [shape: f32[1,2], index: 6, kind: input, shape index: {}]   ;;  %s444_s7 = inlined_call_operand.vmem [shape: f32[8,2], index: 7, kind: output, shape index: {}]  }
   0x1   :  { %310 = vmatprep.subr.mxu0 %v352_v0  ;;  %v27_v1 = vld [vmem:[%s437_s1] sm:$0xf]  ;;  %312 = vmatprep.mubr.msk.f32.mxu0 %vm353_vm2, %v352_v0  ;;  %v354_v4 = vmov 0.0|0.0   ;;  %v115_v5 = vld [vmem:[%s439_s3 + $0x8] sm:$0xff]  ;;  %v116_v7 = vld [vmem:[%s439_s3 + $0x10] sm:$0xff]  ;;  %vm125_vm3 = vcmask 261120  }
   0x2   :  { %v26_v2 = vld [vmem:[%s438_s0] sm:$0xff]  ;;  %311 = vmatpush3.msk.msra.mxu0 %vm39_vm0, %v27_v1  ;;  %337 = vmatprep.subr.bf16.mxu1 %v354_v4  ;;  %v117_v8 = vld [vmem:[%s439_s3 + $0x18] sm:$0xff]  ;;  %v201_v11 = vld [vmem:[%s440_s5 + $0x8] sm:$0xff]  ;;  %vm285_vm4 = vcmask 15360  }
   0x3   :  { %v114_v3 = vld [vmem:[%s439_s3] sm:$0xff]  ;;  %313 = vmatmul.mubr.msk.f32.vlgmr.msra.gmra.mrb[0].mxu0 %vm35_vm1, %v26_v2  ;;  %323 = vmatprep.mubr.msk.f32.mxu1 %vm353_vm2, %v352_v0  ;;  %v341_v9 = vpack.c.bf16 %v117_v8, %v116_v7  ;;  %v202_v18 = vld [vmem:[%s440_s5 + $0x10] sm:$0xff]  ;;  %v203_v19 = vld [vmem:[%s440_s5 + $0x18] sm:$0xff] }
   0x4   :  { %v338_v6 = vpack.c.bf16 %v115_v5, %v114_v3  ;;  %343 = vmatprep.subr.bf16.mxu0 %v354_v4  ;;  %334 = vmatprep.mubr.msk.f32.mxu0 %vm353_vm2, %v352_v0  ;;  %v200_v10 = vld [vmem:[%s440_s5] sm:$0xff]  ;;  %v347_v20 = vpack.c.bf16 %v203_v19, %v202_v18 }
   0x5   :  { %v344_v12 = vpack.c.bf16 %v201_v11, %v200_v10  ;;  %v291_v13 = vld [vmem:[%s441_s2] ss:$0 sm:$0xff] }
   0x6   :  { %339 = vmatpush3.bf16.msra.mxu1 %v338_v6  ;;  %v294_v21 = vld [vmem:[%s442_s4] ss:$0 sm:$0xff] }
   0x7   :  { %340 = vmatprep.subr.bf16.mxu1 %v354_v4  ;;  %345 = vmatpush3.bf16.msra.mxu0 %v344_v12  ;;  %v296_v26 = vld [vmem:[%s443_s6] ss:$0 sm:$0xff] }
   0x8   :  { %346 = vmatprep.subr.bf16.mxu0 %v354_v4 }
   0xa   :  { %342 = vmatpush3.bf16.msra.mxu1 %v341_v9 }
   0xb   :  { %348 = vmatpush3.bf16.msra.mxu0 %v347_v20 }
  0xd6   :  { %v109_v14 = vpop.f32.mrb[0].mxu0 }
  0xd7   :  { %v110_v15 = vadd.f32 %v291_v13, %v109_v14  ;;  %v314_v16 = vpop.f32.mrb[1].mxu0 }
  0xd9   :  { %v113_v17 = vmax.f32 %v110_v15, 0.0 }
  0xdb   :  { %324 = vmatmul.mubr.msk.f32.vlgmr.msra.gmra.mrb[0].mxu1 %vm125_vm3, %v113_v17 }
 0x1ae   :  { %v195_v22 = vpop.f32.mrb[0].mxu1 }
 0x1af   :  { %v196_v23 = vadd.f32 %v294_v21, %v195_v22  ;;  %v325_v24 = vpop.f32.mrb[1].mxu1 }
 0x1b1   :  { %v199_v25 = vmax.f32 %v196_v23, 0.0 }
 0x1b3   :  { %335 = vmatmul.mubr.msk.f32.vlgmr.msra.gmra.mrb[2].mxu0 %vm125_vm3, %v199_v25 }
 0x286   :  { %v280_v27 = vpop.f32.mrb[2].mxu0 }
 0x287   :  { %v281_v28 = vadd.f32 %v296_v26, %v280_v27  ;;  %v336_v29 = vpop.f32.mrb[3].mxu0 }
 0x289   :  { %v284_v30 = vmax.f32 %v281_v28, 0.0 }
 0x28b   :  { %286 = vst.msk [vmem:[%s444_s7] sm:$0xff] %vm285_vm4, %v284_v30 }

</bundles_post_ra>
